<compile_context>
chip_gen: v7x
topology: tpu7x:2x2x1
jax: 0.10.0
libtpu: 0.0.40
codegen_flags: <defaults>
</compile_context>

<pallas_src>
import functools
import math

import jax
import jax.numpy as jnp
from jax.experimental import pallas as pl
from jax.experimental.pallas import tpu as pltpu

SIG = 7          # number of "signal" features (module hard-codes +7)
FEAT = 128       # padded lane width for every in-kernel tensor
BATCH_PAD = 8    # sublane padding of the (batch=1) row dimension


# ---------------------------------------------------------------------------
# Kernel 1: batched (non-recurrent) projection   y = x @ W  [+ LogSoftmax]
#   Used twice:
#     prepass : xproj = X @ W1                (input projection, all steps)
#     postpass: out   = LogSoftmax(Y @ W2)    (o2o + bias + mask folded in W2)
# ---------------------------------------------------------------------------
def proj_kernel(x_ref, w_ref, o_ref, *, log_softmax):
    y = jnp.dot(x_ref[...].astype(jnp.bfloat16), w_ref[...],
                preferred_element_type=jnp.float32)
    if log_softmax:
        # Pad lanes carry -1e30 (folded into W2) -> contribute exp(..) == 0.
        m = jnp.max(y, axis=-1, keepdims=True)
        lse = jnp.log(jnp.sum(jnp.exp(y - m), axis=-1, keepdims=True)) + m
        y = y - lse
    o_ref[...] = y


def batched_proj(x2d, w, *, row_tile, log_softmax):
    """Row-tiled dense projection over (rows, FEAT) with resident weights."""
    rows = x2d.shape[0]
    kernel = functools.partial(proj_kernel, log_softmax=log_softmax)
    return pl.pallas_call(
        kernel,
        grid=(rows // row_tile,),
        in_specs=[pl.BlockSpec((row_tile, FEAT), lambda i: (i, 0)),
                  pl.BlockSpec((FEAT, FEAT), lambda i: (0, 0))],
        out_specs=pl.BlockSpec((row_tile, FEAT), lambda i: (i, 0)),
        out_shape=jax.ShapeDtypeStruct((rows, FEAT), jnp.float32),
        compiler_params=pltpu.CompilerParams(
            dimension_semantics=("parallel",)),      # independent rows
    )(x2d, w)


# ---------------------------------------------------------------------------
# Kernel 2: the serial recurrence.  One grid step == U time steps.
#   y_t = state_{t-1} @ W1_rec + xproj_t ;  state_t = y_t
#   y_t columns: [hidden_t | out1_t | 1 | 0-pad]   (W2 pass is deferred)
# ---------------------------------------------------------------------------
def recurrent_kernel(xproj_ref, h0_ref, w1r_ref, y_ref, state_ref, *, steps):
    c = pl.program_id(0)

    @pl.when(c == 0)
    def _():
        state_ref[...] = h0_ref[...]

    def step(i, carry):
        y = jnp.dot(state_ref[...].astype(jnp.bfloat16), w1r_ref[...],
                    preferred_element_type=jnp.float32) + xproj_ref[i]
        y_ref[i] = y
        state_ref[...] = y
        return carry

    jax.lax.fori_loop(0, steps, step, 0, unroll=True)


# ---------------------------------------------------------------------------
# Parameter packing (torch nn.Linear layout -> padded bf16 (128,128) tiles)
# ---------------------------------------------------------------------------
def pack_params(torch_params, input_size, hidden_size, output_size):
    w_i2h, b_i2h, w_i2o, b_i2o, w_o2o, b_o2o = torch_params
    H, O, I = hidden_size, output_size, input_size
    C = SIG + I + H                                  # original input_combined width
    assert C + 1 <= FEAT and H + O + 1 <= FEAT

    # Kernel column order of input_combined: [hidden | signal | input | 1 | pad].
    perm = jnp.concatenate([jnp.arange(SIG + I, C), jnp.arange(0, SIG + I)])

    w1 = jnp.zeros((FEAT, FEAT), jnp.float32)
    w1 = w1.at[:C, :H].set(w_i2h.T[perm])            # i2h
    w1 = w1.at[:C, H:H + O].set(w_i2o.T[perm])       # i2o
    w1 = w1.at[C, :H].set(b_i2h)                     # biases via the "1" lane
    w1 = w1.at[C, H:H + O].set(b_i2o)
    w1 = w1.at[C, H + O].set(1.0)                    # propagate "1" through layer 1

    # Recurrent part: only hidden rows (< H) contract against the carried state.
    w1_rec = w1.at[H:, :].set(0.0)

    w2 = jnp.zeros((FEAT, FEAT), jnp.float32)
    w2 = w2.at[:H + O, :O].set(w_o2o.T)              # matches cat(hidden, out1)
    w2 = w2.at[H + O, :O].set(b_o2o)                 # folded o2o bias
    w2 = w2.at[H + O, O:].set(-1e30)                 # mask pad lanes for LogSoftmax
    return (w1.astype(jnp.bfloat16),
            w1_rec.astype(jnp.bfloat16),
            w2.astype(jnp.bfloat16))


# ---------------------------------------------------------------------------
# Wrapper: T chained module-forward steps
# ---------------------------------------------------------------------------
@functools.partial(jax.jit, static_argnames=("input_size", "hidden_size",
                                             "output_size", "steps_per_block"))
def rnn_sequence(signals, inputs, hidden0, w1, w1_rec, w2, *,
                 input_size, hidden_size, output_size, steps_per_block=None):
    """signals: (T, 7), inputs: (T, input_size), hidden0: (1, hidden_size).
    Returns (outputs (T, 1, output_size), final hidden (1, hidden_size))."""
    H, O, I = hidden_size, output_size, input_size
    T = inputs.shape[0]
    C = SIG + I + H

    U = steps_per_block
    if U is None:
        U = T if T <= 64 else 32                     # small T -> one grid step
    U = max(1, min(U, T))
    T_pad = U * pl.cdiv(T, U)

    # Per-step non-recurrent part of input_combined (batch row 0 only):
    #   lanes [H:H+7]=signal, [H+7:H+7+I]=input, lane C = 1.0 (bias folding).
    x = jnp.zeros((T_pad, BATCH_PAD, FEAT), jnp.float32)
    x = x.at[:T, 0, H:H + SIG].set(signals.astype(jnp.float32).reshape(T, SIG))
    x = x.at[:T, 0, H + SIG:H + SIG + I].set(inputs.astype(jnp.float32))
    x = x.at[:T, 0, C].set(1.0)

    h0 = jnp.zeros((BATCH_PAD, FEAT), jnp.float32)
    h0 = h0.at[0, :H].set(hidden0.astype(jnp.float32).reshape(-1))

    rows = T_pad * BATCH_PAD
    row_tile = U * BATCH_PAD

    # Pass 1 (batched, parallel): input projection for all steps at once.
    xproj = batched_proj(x.reshape(rows, FEAT), w1,
                         row_tile=row_tile, log_softmax=False)
    xproj = xproj.reshape(T_pad, BATCH_PAD, FEAT)

    # Pass 2 (serial recurrence, U steps per grid iteration).
    kernel = functools.partial(recurrent_kernel, steps=U)
    y = pl.pallas_call(
        kernel,
        grid=(T_pad // U,),
        in_specs=[
            pl.BlockSpec((U, BATCH_PAD, FEAT), lambda c: (c, 0, 0)),  # xproj chunk
            pl.BlockSpec((BATCH_PAD, FEAT), lambda c: (0, 0)),        # h0 resident
            pl.BlockSpec((FEAT, FEAT), lambda c: (0, 0)),             # W1_rec resident
        ],
        out_specs=pl.BlockSpec((U, BATCH_PAD, FEAT), lambda c: (c, 0, 0)),
        out_shape=jax.ShapeDtypeStruct((T_pad, BATCH_PAD, FEAT), jnp.float32),
        scratch_shapes=[pltpu.VMEM((BATCH_PAD, FEAT), jnp.float32)],
        compiler_params=pltpu.CompilerParams(
            dimension_semantics=("arbitrary",)),     # hidden carried across chunks
    )(xproj, h0, w1_rec)

    # Pass 3 (batched, parallel): o2o + bias + LogSoftmax off the critical path.
    # Dropout(p=0.1) in eval mode -> identity.
    logp = batched_proj(y.reshape(rows, FEAT), w2,
                        row_tile=row_tile, log_softmax=True)
    logp = logp.reshape(T_pad, BATCH_PAD, FEAT)

    outputs = logp[:T, 0:1, :O]          # (T, 1, O)
    hidden_final = y[T - 1, 0:1, :H]     # (1, H) -- hidden lanes of last y_t
    return outputs, hidden_final


def rnn_step(signal, inp, hidden, w1, w1_rec, w2, *,
             input_size, hidden_size, output_size):
    """Exact equivalent of RNN.forward(signal, input, hidden) (batch=1)."""
    sig = jnp.reshape(signal, (1, -1))                    # flatten + unsqueeze(0)
    outs, new_hidden = rnn_sequence(sig, jnp.reshape(inp, (1, -1)), hidden,
                                    w1, w1_rec, w2,
                                    input_size=input_size, hidden_size=hidden_size,
                                    output_size=output_size)
    return outs[0], new_hidden


# ---------------------------------------------------------------------------
# Pure-JAX reference (verification only)
# ---------------------------------------------------------------------------
def rnn_ref_step(signal, inp, hidden, torch_params):
    w_i2h, b_i2h, w_i2o, b_i2o, w_o2o, b_o2o = torch_params
    hp = jax.lax.Precision.HIGHEST
    sig = jnp.reshape(signal, (1, -1))
    comb = jnp.concatenate([sig, inp, hidden], axis=1)
    out1 = jnp.dot(comb, w_i2o.T, precision=hp) + b_i2o
    hid = jnp.dot(comb, w_i2h.T, precision=hp) + b_i2h
    out2 = jnp.dot(jnp.concatenate([hid, out1], axis=1), w_o2o.T, precision=hp) + b_o2o
    out = out2 - jax.scipy.special.logsumexp(out2, axis=1, keepdims=True)
    return out, hid


def _init_linear(key, fan_in, fan_out):
    kw, kb = jax.random.split(key)
    bound = 1.0 / math.sqrt(fan_in)
    w = jax.random.uniform(kw, (fan_out, fan_in), jnp.float32, -bound, bound)
    b = jax.random.uniform(kb, (fan_out,), jnp.float32, -bound, bound)
    return w, b


if __name__ == "__main__":
    input_size, hidden_size, output_size = 32, 32, 24
    T = 8
    C = SIG + input_size + hidden_size

    key = jax.random.PRNGKey(0)
    k_ih, k_io, k_oo, k_sig, k_inp = jax.random.split(key, 5)

    w_i2h, b_i2h = _init_linear(k_ih, C, hidden_size)
    w_i2o, b_i2o = _init_linear(k_io, C, output_size)
    w_o2o, b_o2o = _init_linear(k_oo, hidden_size + output_size, output_size)
    torch_params = (w_i2h, b_i2h, w_i2o, b_i2o, w_o2o, b_o2o)

    w1, w1_rec, w2 = pack_params(torch_params, input_size, hidden_size, output_size)

    signals = jax.random.normal(k_sig, (T, SIG), jnp.float32)
    inputs = jax.random.normal(k_inp, (T, input_size), jnp.float32)
    hidden0 = jnp.zeros((1, hidden_size), jnp.float32)       # initHidden()

    # --- sequence: T chained module-forward steps ---
    outs, hid_final = rnn_sequence(signals, inputs, hidden0, w1, w1_rec, w2,
                                   input_size=input_size, hidden_size=hidden_size,
                                   output_size=output_size)
    jax.block_until_ready((outs, hid_final))

    # --- pure-JAX f32 reference loop (one module forward per step) ---
    ref_outs = []
    h = hidden0
    for t in range(T):
        o, h = rnn_ref_step(signals[t], inputs[t:t + 1], h, torch_params)
        ref_outs.append(o)
    ref_outs = jnp.stack(ref_outs)                           # (T, 1, O)

    assert outs.shape == (T, 1, output_size)
    assert hid_final.shape == (1, hidden_size)
    # log-softmax rows normalize exactly (pad lanes contribute exp(-1e30) == 0)
    assert float(jnp.max(jnp.abs(jax.scipy.special.logsumexp(outs, axis=-1)))) < 1e-3
    # bf16 MXU operands vs Precision.HIGHEST f32 reference -> loose tolerance
    assert float(jnp.max(jnp.abs(outs - ref_outs))) < 2e-1
    assert float(jnp.max(jnp.abs(hid_final - h))) < 1.5e-1

    # --- single-step API (exact module-forward signature), T = 1 path ---
    out_s, hid_s = rnn_step(signals[0], inputs[0:1], hidden0, w1, w1_rec, w2,
                            input_size=input_size, hidden_size=hidden_size,
                            output_size=output_size)
    ro, rh = rnn_ref_step(signals[0], inputs[0:1], hidden0, torch_params)
    jax.block_until_ready((out_s, hid_s))
    assert out_s.shape == (1, output_size) and hid_s.shape == (1, hidden_size)
    assert float(jnp.max(jnp.abs(out_s - ro))) < 1e-1
    assert float(jnp.max(jnp.abs(hid_s - rh))) < 1e-1

    print("KERNEL_OK")
</pallas_src>

<mosaic_0001>
module attributes {stable_mosaic.version = 11 : i64} {
  func.func @proj_kernel(%arg0: i32, %arg1: memref<64x128xf32, #tpu.memory_space<vmem>>, %arg2: memref<128x128xbf16, #tpu.memory_space<vmem>>, %arg3: memref<64x128xf32, #tpu.memory_space<vmem>>) attributes {dimension_semantics = [#tpu.dimension_semantics<parallel>], iteration_bounds = array<i64: 1>, scalar_prefetch = 0 : i64, scratch_operands = 0 : i64, tpu.core_type = #tpu.core_type<tc>, window_params = [{transform_indices = @transform_0, window_bounds = array<i64: 64, 128>}, {pipeline_mode = #tpu.pipeline_mode<synchronous>, transform_indices = @transform_1, window_bounds = array<i64: 128, 128>}, {transform_indices = @transform_2, window_bounds = array<i64: 64, 128>}]} {
    %c0 = arith.constant 0 : index
    %c0_0 = arith.constant 0 : index
    %0 = vector.load %arg1[%c0, %c0_0] : memref<64x128xf32, #tpu.memory_space<vmem>>, vector<64x128xf32>
    %1 = arith.truncf %0 : vector<64x128xf32> to vector<64x128xbf16>
    %c0_1 = arith.constant 0 : index
    %c0_2 = arith.constant 0 : index
    %2 = vector.load %arg2[%c0_1, %c0_2] : memref<128x128xbf16, #tpu.memory_space<vmem>>, vector<128x128xbf16>
    %cst = arith.constant dense<0.000000e+00> : vector<64x128xf32>
    %3 = tpu.matmul %1, %2, %cst {dimension_numbers = #tpu.dot_dimension_numbers<[1], [0], [0], [1], [0, 0, 1, 1], [], []>} : vector<64x128xbf16>, vector<128x128xbf16>, vector<64x128xf32> -> vector<64x128xf32>
    %c0_3 = arith.constant 0 : index
    %c0_4 = arith.constant 0 : index
    %4 = vector.load %arg3[%c0_3, %c0_4] : memref<64x128xf32, #tpu.memory_space<vmem>>, vector<64x128xf32>
    tpu.vector_store %arg3[%c0_3, %c0_4], %3 {strides = array<i32>} : memref<64x128xf32, #tpu.memory_space<vmem>>, vector<64x128xf32>,
    return
  }
  func.func @transform_0(%arg0: i32) -> (i32, i32) {
    %c0_i32 = arith.constant 0 : i32
    %c0_i32_0 = arith.constant 0 : i32
    return %arg0, %c0_i32 : i32, i32
  }
  func.func @transform_1(%arg0: i32) -> (i32, i32) {
    %c0_i32 = arith.constant 0 : i32
    %c0_i32_0 = arith.constant 0 : i32
    %c0_i32_1 = arith.constant 0 : i32
    return %c0_i32, %c0_i32_0 : i32, i32
  }
  func.func @transform_2(%arg0: i32) -> (i32, i32) {
    %c0_i32 = arith.constant 0 : i32
    %c0_i32_0 = arith.constant 0 : i32
    return %arg0, %c0_i32 : i32, i32
  }
}

module attributes {stable_mosaic.version = 11 : i64} {
  func.func @proj_kernel(%arg0: i32, %arg1: memref<64x128xf32, #tpu.memory_space<vmem>>, %arg2: memref<128x128xbf16, #tpu.memory_space<vmem>>, %arg3: memref<64x128xf32, #tpu.memory_space<vmem>>) attributes {dimension_semantics = [#tpu.dimension_semantics<parallel>], iteration_bounds = array<i64: 1>, scalar_prefetch = 0 : i64, scratch_operands = 0 : i64, tpu.core_type = #tpu.core_type<tc>, window_params = [{transform_indices = @transform_0, window_bounds = array<i64: 64, 128>}, {pipeline_mode = #tpu.pipeline_mode<synchronous>, transform_indices = @transform_1, window_bounds = array<i64: 128, 128>}, {transform_indices = @transform_2, window_bounds = array<i64: 64, 128>}]} {
    %c0 = arith.constant 0 : index
    %c0_0 = arith.constant 0 : index
    %0 = vector.load %arg1[%c0, %c0_0] : memref<64x128xf32, #tpu.memory_space<vmem>>, vector<64x128xf32>
    %1 = arith.truncf %0 : vector<64x128xf32> to vector<64x128xbf16>
    %c0_1 = arith.constant 0 : index
    %c0_2 = arith.constant 0 : index
    %2 = vector.load %arg2[%c0_1, %c0_2] : memref<128x128xbf16, #tpu.memory_space<vmem>>, vector<128x128xbf16>
    %cst = arith.constant dense<0.000000e+00> : vector<64x128xf32>
    %3 = tpu.matmul %1, %2, %cst {dimension_numbers = #tpu.dot_dimension_numbers<[1], [0], [0], [1], [0, 0, 1, 1], [], []>} : vector<64x128xbf16>, vector<128x128xbf16>, vector<64x128xf32> -> vector<64x128xf32>
    %cst_3 = arith.constant dense<0xFF800000> : vector<64xf32>
    %4 = vector.multi_reduction <maximumf>, %3, %cst_3 [1] : vector<64x128xf32> to vector<64xf32>
    %5 = vector.shape_cast %4 : vector<64xf32> to vector<64x1xf32>
    %6 = vector.broadcast %5 : vector<64x1xf32> to vector<64x128xf32>
    %7 = arith.subf %3, %6 : vector<64x128xf32>
    %8 = math.exp %7 : vector<64x128xf32>
    %cst_4 = arith.constant dense<0.000000e+00> : vector<64xf32>
    %9 = vector.multi_reduction <add>, %8, %cst_4 [1] : vector<64x128xf32> to vector<64xf32>
    %10 = vector.shape_cast %9 : vector<64xf32> to vector<64x1xf32>
    %11 = math.log %10 : vector<64x1xf32>
    %12 = arith.addf %11, %5 : vector<64x1xf32>
    %13 = vector.broadcast %12 : vector<64x1xf32> to vector<64x128xf32>
    %14 = arith.subf %3, %13 : vector<64x128xf32>
    %c0_5 = arith.constant 0 : index
    %c0_6 = arith.constant 0 : index
    %15 = vector.load %arg3[%c0_5, %c0_6] : memref<64x128xf32, #tpu.memory_space<vmem>>, vector<64x128xf32>
    tpu.vector_store %arg3[%c0_5, %c0_6], %14 {strides = array<i32>} : memref<64x128xf32, #tpu.memory_space<vmem>>, vector<64x128xf32>,
    return
  }
  func.func @transform_0(%arg0: i32) -> (i32, i32) {
    %c0_i32 = arith.constant 0 : i32
    %c0_i32_0 = arith.constant 0 : i32
    return %arg0, %c0_i32 : i32, i32
  }
  func.func @transform_1(%arg0: i32) -> (i32, i32) {
    %c0_i32 = arith.constant 0 : i32
    %c0_i32_0 = arith.constant 0 : i32
    %c0_i32_1 = arith.constant 0 : i32
    return %c0_i32, %c0_i32_0 : i32, i32
  }
  func.func @transform_2(%arg0: i32) -> (i32, i32) {
    %c0_i32 = arith.constant 0 : i32
    %c0_i32_0 = arith.constant 0 : i32
    return %arg0, %c0_i32 : i32, i32
  }
}

module attributes {stable_mosaic.version = 11 : i64} {
  func.func @recurrent_kernel(%arg0: i32, %arg1: memref<8x8x128xf32, #tpu.memory_space<vmem>>, %arg2: memref<8x128xf32, #tpu.memory_space<vmem>>, %arg3: memref<128x128xbf16, #tpu.memory_space<vmem>>, %arg4: memref<8x8x128xf32, #tpu.memory_space<vmem>>, %arg5: memref<8x128xf32, #tpu.memory_space<vmem>>) attributes {dimension_semantics = [#tpu.dimension_semantics<arbitrary>], iteration_bounds = array<i64: 1>, scalar_prefetch = 0 : i64, scratch_operands = 1 : i64, tpu.core_type = #tpu.core_type<tc>, window_params = [{transform_indices = @transform_0, window_bounds = array<i64: 8, 8, 128>}, {pipeline_mode = #tpu.pipeline_mode<synchronous>, transform_indices = @transform_1, window_bounds = array<i64: 8, 128>}, {pipeline_mode = #tpu.pipeline_mode<synchronous>, transform_indices = @transform_2, window_bounds = array<i64: 128, 128>}, {transform_indices = @transform_3, window_bounds = array<i64: 8, 8, 128>}]} {
    %c0_i32 = arith.constant 0 : i32
    %0 = arith.cmpi eq, %arg0, %c0_i32 : i32
    %1 = arith.extui %0 : i1 to i32
    %c0_i32_0 = arith.constant 0 : i32
    %2 = arith.cmpi ne, %1, %c0_i32_0 : i32
    scf.if %2 {
      %c0_88 = arith.constant 0 : index
      %c0_89 = arith.constant 0 : index
      %107 = vector.load %arg2[%c0_88, %c0_89] : memref<8x128xf32, #tpu.memory_space<vmem>>, vector<8x128xf32>
      %c0_90 = arith.constant 0 : index
      %c0_91 = arith.constant 0 : index
      %108 = vector.load %arg5[%c0_90, %c0_91] : memref<8x128xf32, #tpu.memory_space<vmem>>, vector<8x128xf32>
      tpu.vector_store %arg5[%c0_90, %c0_91], %107 {strides = array<i32>} : memref<8x128xf32, #tpu.memory_space<vmem>>, vector<8x128xf32>,
    } else {
    }
    %c0_i32_1 = arith.constant 0 : i32
    %c0 = arith.constant 0 : index
    %c0_2 = arith.constant 0 : index
    %3 = vector.load %arg5[%c0, %c0_2] : memref<8x128xf32, #tpu.memory_space<vmem>>, vector<8x128xf32>
    %4 = arith.truncf %3 : vector<8x128xf32> to vector<8x128xbf16>
    %c0_3 = arith.constant 0 : index
    %c0_4 = arith.constant 0 : index
    %5 = vector.load %arg3[%c0_3, %c0_4] : memref<128x128xbf16, #tpu.memory_space<vmem>>, vector<128x128xbf16>
    %cst = arith.constant dense<0.000000e+00> : vector<8x128xf32>
    %6 = tpu.matmul %4, %5, %cst {dimension_numbers = #tpu.dot_dimension_numbers<[1], [0], [0], [1], [0, 0, 1, 1], [], []>} : vector<8x128xbf16>, vector<128x128xbf16>, vector<8x128xf32> -> vector<8x128xf32>
    %7 = arith.index_cast %c0_i32_1 : i32 to index
    %c0_5 = arith.constant 0 : index
    %c0_6 = arith.constant 0 : index
    %8 = vector.load %arg1[%7, %c0_5, %c0_6] : memref<8x8x128xf32, #tpu.memory_space<vmem>>, vector<1x8x128xf32>
    %9 = vector.shape_cast %8 : vector<1x8x128xf32> to vector<8x128xf32>
    %10 = arith.addf %6, %9 : vector<8x128xf32>
    %11 = arith.index_cast %c0_i32_1 : i32 to index
    %c0_7 = arith.constant 0 : index
    %c0_8 = arith.constant 0 : index
    %12 = vector.load %arg4[%11, %c0_7, %c0_8] : memref<8x8x128xf32, #tpu.memory_space<vmem>>, vector<1x8x128xf32>
    %13 = vector.shape_cast %12 : vector<1x8x128xf32> to vector<8x128xf32>
    %14 = vector.shape_cast %10 : vector<8x128xf32> to vector<1x8x128xf32>
    tpu.vector_store %arg4[%11, %c0_7, %c0_8], %14 {strides = array<i32>} : memref<8x8x128xf32, #tpu.memory_space<vmem>>, vector<1x8x128xf32>,
    %c0_9 = arith.constant 0 : index
    %c0_10 = arith.constant 0 : index
    %15 = vector.load %arg5[%c0_9, %c0_10] : memref<8x128xf32, #tpu.memory_space<vmem>>, vector<8x128xf32>
    tpu.vector_store %arg5[%c0_9, %c0_10], %10 {strides = array<i32>} : memref<8x128xf32, #tpu.memory_space<vmem>>, vector<8x128xf32>,
    %c1_i32 = arith.constant 1 : i32
    %c0_11 = arith.constant 0 : index
    %c0_12 = arith.constant 0 : index
    %16 = vector.load %arg5[%c0_11, %c0_12] : memref<8x128xf32, #tpu.memory_space<vmem>>, vector<8x128xf32>
    %17 = arith.truncf %16 : vector<8x128xf32> to vector<8x128xbf16>
    %c0_13 = arith.constant 0 : index
    %c0_14 = arith.constant 0 : index
    %18 = vector.load %arg3[%c0_13, %c0_14] : memref<128x128xbf16, #tpu.memory_space<vmem>>, vector<128x128xbf16>
    %cst_15 = arith.constant dense<0.000000e+00> : vector<8x128xf32>
    %19 = tpu.matmul %17, %18, %cst_15 {dimension_numbers = #tpu.dot_dimension_numbers<[1], [0], [0], [1], [0, 0, 1, 1], [], []>} : vector<8x128xbf16>, vector<128x128xbf16>, vector<8x128xf32> -> vector<8x128xf32>
    %20 = arith.index_cast %c1_i32 : i32 to index
    %c0_16 = arith.constant 0 : index
    %c0_17 = arith.constant 0 : index
    %21 = vector.load %arg1[%20, %c0_16, %c0_17] : memref<8x8x128xf32, #tpu.memory_space<vmem>>, vector<1x8x128xf32>
    %22 = vector.shape_cast %21 : vector<1x8x128xf32> to vector<8x128xf32>
    %23 = arith.addf %19, %22 : vector<8x128xf32>
    %24 = arith.index_cast %c1_i32 : i32 to index
    %c0_18 = arith.constant 0 : index
    %c0_19 = arith.constant 0 : index
    %25 = vector.load %arg4[%24, %c0_18, %c0_19] : memref<8x8x128xf32, #tpu.memory_space<vmem>>, vector<1x8x128xf32>
    %26 = vector.shape_cast %25 : vector<1x8x128xf32> to vector<8x128xf32>
    %27 = vector.shape_cast %23 : vector<8x128xf32> to vector<1x8x128xf32>
    tpu.vector_store %arg4[%24, %c0_18, %c0_19], %27 {strides = array<i32>} : memref<8x8x128xf32, #tpu.memory_space<vmem>>, vector<1x8x128xf32>,
    %c0_20 = arith.constant 0 : index
    %c0_21 = arith.constant 0 : index
    %28 = vector.load %arg5[%c0_20, %c0_21] : memref<8x128xf32, #tpu.memory_space<vmem>>, vector<8x128xf32>
    tpu.vector_store %arg5[%c0_20, %c0_21], %23 {strides = array<i32>} : memref<8x128xf32, #tpu.memory_space<vmem>>, vector<8x128xf32>,
    %c2_i32 = arith.constant 2 : i32
    %c0_22 = arith.constant 0 : index
    %c0_23 = arith.constant 0 : index
    %29 = vector.load %arg5[%c0_22, %c0_23] : memref<8x128xf32, #tpu.memory_space<vmem>>, vector<8x128xf32>
    %30 = arith.truncf %29 : vector<8x128xf32> to vector<8x128xbf16>
    %c0_24 = arith.constant 0 : index
    %c0_25 = arith.constant 0 : index
    %31 = vector.load %arg3[%c0_24, %c0_25] : memref<128x128xbf16, #tpu.memory_space<vmem>>, vector<128x128xbf16>
    %cst_26 = arith.constant dense<0.000000e+00> : vector<8x128xf32>
    %32 = tpu.matmul %30, %31, %cst_26 {dimension_numbers = #tpu.dot_dimension_numbers<[1], [0], [0], [1], [0, 0, 1, 1], [], []>} : vector<8x128xbf16>, vector<128x128xbf16>, vector<8x128xf32> -> vector<8x128xf32>
    %33 = arith.index_cast %c2_i32 : i32 to index
    %c0_27 = arith.constant 0 : index
    %c0_28 = arith.constant 0 : index
    %34 = vector.load %arg1[%33, %c0_27, %c0_28] : memref<8x8x128xf32, #tpu.memory_space<vmem>>, vector<1x8x128xf32>
    %35 = vector.shape_cast %34 : vector<1x8x128xf32> to vector<8x128xf32>
    %36 = arith.addf %32, %35 : vector<8x128xf32>
    %37 = arith.index_cast %c2_i32 : i32 to index
    %c0_29 = arith.constant 0 : index
    %c0_30 = arith.constant 0 : index
    %38 = vector.load %arg4[%37, %c0_29, %c0_30] : memref<8x8x128xf32, #tpu.memory_space<vmem>>, vector<1x8x128xf32>
    %39 = vector.shape_cast %38 : vector<1x8x128xf32> to vector<8x128xf32>
    %40 = vector.shape_cast %36 : vector<8x128xf32> to vector<1x8x128xf32>
    tpu.vector_store %arg4[%37, %c0_29, %c0_30], %40 {strides = array<i32>} : memref<8x8x128xf32, #tpu.memory_space<vmem>>, vector<1x8x128xf32>,
    %c0_31 = arith.constant 0 : index
    %c0_32 = arith.constant 0 : index
    %41 = vector.load %arg5[%c0_31, %c0_32] : memref<8x128xf32, #tpu.memory_space<vmem>>, vector<8x128xf32>
    tpu.vector_store %arg5[%c0_31, %c0_32], %36 {strides = array<i32>} : memref<8x128xf32, #tpu.memory_space<vmem>>, vector<8x128xf32>,
    %c3_i32 = arith.constant 3 : i32
    %c0_33 = arith.constant 0 : index
    %c0_34 = arith.constant 0 : index
    %42 = vector.load %arg5[%c0_33, %c0_34] : memref<8x128xf32, #tpu.memory_space<vmem>>, vector<8x128xf32>
    %43 = arith.truncf %42 : vector<8x128xf32> to vector<8x128xbf16>
    %c0_35 = arith.constant 0 : index
    %c0_36 = arith.constant 0 : index
    %44 = vector.load %arg3[%c0_35, %c0_36] : memref<128x128xbf16, #tpu.memory_space<vmem>>, vector<128x128xbf16>
    %cst_37 = arith.constant dense<0.000000e+00> : vector<8x128xf32>
    %45 = tpu.matmul %43, %44, %cst_37 {dimension_numbers = #tpu.dot_dimension_numbers<[1], [0], [0], [1], [0, 0, 1, 1], [], []>} : vector<8x128xbf16>, vector<128x128xbf16>, vector<8x128xf32> -> vector<8x128xf32>
    %46 = arith.index_cast %c3_i32 : i32 to index
    %c0_38 = arith.constant 0 : index
    %c0_39 = arith.constant 0 : index
    %47 = vector.load %arg1[%46, %c0_38, %c0_39] : memref<8x8x128xf32, #tpu.memory_space<vmem>>, vector<1x8x128xf32>
    %48 = vector.shape_cast %47 : vector<1x8x128xf32> to vector<8x128xf32>
    %49 = arith.addf %45, %48 : vector<8x128xf32>
    %50 = arith.index_cast %c3_i32 : i32 to index
    %c0_40 = arith.constant 0 : index
    %c0_41 = arith.constant 0 : index
    %51 = vector.load %arg4[%50, %c0_40, %c0_41] : memref<8x8x128xf32, #tpu.memory_space<vmem>>, vector<1x8x128xf32>
    %52 = vector.shape_cast %51 : vector<1x8x128xf32> to vector<8x128xf32>
    %53 = vector.shape_cast %49 : vector<8x128xf32> to vector<1x8x128xf32>
    tpu.vector_store %arg4[%50, %c0_40, %c0_41], %53 {strides = array<i32>} : memref<8x8x128xf32, #tpu.memory_space<vmem>>, vector<1x8x128xf32>,
    %c0_42 = arith.constant 0 : index
    %c0_43 = arith.constant 0 : index
    %54 = vector.load %arg5[%c0_42, %c0_43] : memref<8x128xf32, #tpu.memory_space<vmem>>, vector<8x128xf32>
    tpu.vector_store %arg5[%c0_42, %c0_43], %49 {strides = array<i32>} : memref<8x128xf32, #tpu.memory_space<vmem>>, vector<8x128xf32>,
    %c4_i32 = arith.constant 4 : i32
    %c0_44 = arith.constant 0 : index
    %c0_45 = arith.constant 0 : index
    %55 = vector.load %arg5[%c0_44, %c0_45] : memref<8x128xf32, #tpu.memory_space<vmem>>, vector<8x128xf32>
    %56 = arith.truncf %55 : vector<8x128xf32> to vector<8x128xbf16>
    %c0_46 = arith.constant 0 : index
    %c0_47 = arith.constant 0 : index
    %57 = vector.load %arg3[%c0_46, %c0_47] : memref<128x128xbf16, #tpu.memory_space<vmem>>, vector<128x128xbf16>
    %cst_48 = arith.constant dense<0.000000e+00> : vector<8x128xf32>
    %58 = tpu.matmul %56, %57, %cst_48 {dimension_numbers = #tpu.dot_dimension_numbers<[1], [0], [0], [1], [0, 0, 1, 1], [], []>} : vector<8x128xbf16>, vector<128x128xbf16>, vector<8x128xf32> -> vector<8x128xf32>
    %59 = arith.index_cast %c4_i32 : i32 to index
    %c0_49 = arith.constant 0 : index
    %c0_50 = arith.constant 0 : index
    %60 = vector.load %arg1[%59, %c0_49, %c0_50] : memref<8x8x128xf32, #tpu.memory_space<vmem>>, vector<1x8x128xf32>
    %61 = vector.shape_cast %60 : vector<1x8x128xf32> to vector<8x128xf32>
    %62 = arith.addf %58, %61 : vector<8x128xf32>
    %63 = arith.index_cast %c4_i32 : i32 to index
    %c0_51 = arith.constant 0 : index
    %c0_52 = arith.constant 0 : index
    %64 = vector.load %arg4[%63, %c0_51, %c0_52] : memref<8x8x128xf32, #tpu.memory_space<vmem>>, vector<1x8x128xf32>
    %65 = vector.shape_cast %64 : vector<1x8x128xf32> to vector<8x128xf32>
    %66 = vector.shape_cast %62 : vector<8x128xf32> to vector<1x8x128xf32>
    tpu.vector_store %arg4[%63, %c0_51, %c0_52], %66 {strides = array<i32>} : memref<8x8x128xf32, #tpu.memory_space<vmem>>, vector<1x8x128xf32>,
    %c0_53 = arith.constant 0 : index
    %c0_54 = arith.constant 0 : index
    %67 = vector.load %arg5[%c0_53, %c0_54] : memref<8x128xf32, #tpu.memory_space<vmem>>, vector<8x128xf32>
    tpu.vector_store %arg5[%c0_53, %c0_54], %62 {strides = array<i32>} : memref<8x128xf32, #tpu.memory_space<vmem>>, vector<8x128xf32>,
    %c5_i32 = arith.constant 5 : i32
    %c0_55 = arith.constant 0 : index
    %c0_56 = arith.constant 0 : index
    %68 = vector.load %arg5[%c0_55, %c0_56] : memref<8x128xf32, #tpu.memory_space<vmem>>, vector<8x128xf32>
    %69 = arith.truncf %68 : vector<8x128xf32> to vector<8x128xbf16>
    %c0_57 = arith.constant 0 : index
    %c0_58 = arith.constant 0 : index
    %70 = vector.load %arg3[%c0_57, %c0_58] : memref<128x128xbf16, #tpu.memory_space<vmem>>, vector<128x128xbf16>
    %cst_59 = arith.constant dense<0.000000e+00> : vector<8x128xf32>
    %71 = tpu.matmul %69, %70, %cst_59 {dimension_numbers = #tpu.dot_dimension_numbers<[1], [0], [0], [1], [0, 0, 1, 1], [], []>} : vector<8x128xbf16>, vector<128x128xbf16>, vector<8x128xf32> -> vector<8x128xf32>
    %72 = arith.index_cast %c5_i32 : i32 to index
    %c0_60 = arith.constant 0 : index
    %c0_61 = arith.constant 0 : index
    %73 = vector.load %arg1[%72, %c0_60, %c0_61] : memref<8x8x128xf32, #tpu.memory_space<vmem>>, vector<1x8x128xf32>
    %74 = vector.shape_cast %73 : vector<1x8x128xf32> to vector<8x128xf32>
    %75 = arith.addf %71, %74 : vector<8x128xf32>
    %76 = arith.index_cast %c5_i32 : i32 to index
    %c0_62 = arith.constant 0 : index
    %c0_63 = arith.constant 0 : index
    %77 = vector.load %arg4[%76, %c0_62, %c0_63] : memref<8x8x128xf32, #tpu.memory_space<vmem>>, vector<1x8x128xf32>
    %78 = vector.shape_cast %77 : vector<1x8x128xf32> to vector<8x128xf32>
    %79 = vector.shape_cast %75 : vector<8x128xf32> to vector<1x8x128xf32>
    tpu.vector_store %arg4[%76, %c0_62, %c0_63], %79 {strides = array<i32>} : memref<8x8x128xf32, #tpu.memory_space<vmem>>, vector<1x8x128xf32>,
    %c0_64 = arith.constant 0 : index
    %c0_65 = arith.constant 0 : index
    %80 = vector.load %arg5[%c0_64, %c0_65] : memref<8x128xf32, #tpu.memory_space<vmem>>, vector<8x128xf32>
    tpu.vector_store %arg5[%c0_64, %c0_65], %75 {strides = array<i32>} : memref<8x128xf32, #tpu.memory_space<vmem>>, vector<8x128xf32>,
    %c6_i32 = arith.constant 6 : i32
    %c0_66 = arith.constant 0 : index
    %c0_67 = arith.constant 0 : index
    %81 = vector.load %arg5[%c0_66, %c0_67] : memref<8x128xf32, #tpu.memory_space<vmem>>, vector<8x128xf32>
    %82 = arith.truncf %81 : vector<8x128xf32> to vector<8x128xbf16>
    %c0_68 = arith.constant 0 : index
    %c0_69 = arith.constant 0 : index
    %83 = vector.load %arg3[%c0_68, %c0_69] : memref<128x128xbf16, #tpu.memory_space<vmem>>, vector<128x128xbf16>
    %cst_70 = arith.constant dense<0.000000e+00> : vector<8x128xf32>
    %84 = tpu.matmul %82, %83, %cst_70 {dimension_numbers = #tpu.dot_dimension_numbers<[1], [0], [0], [1], [0, 0, 1, 1], [], []>} : vector<8x128xbf16>, vector<128x128xbf16>, vector<8x128xf32> -> vector<8x128xf32>
    %85 = arith.index_cast %c6_i32 : i32 to index
    %c0_71 = arith.constant 0 : index
    %c0_72 = arith.constant 0 : index
    %86 = vector.load %arg1[%85, %c0_71, %c0_72] : memref<8x8x128xf32, #tpu.memory_space<vmem>>, vector<1x8x128xf32>
    %87 = vector.shape_cast %86 : vector<1x8x128xf32> to vector<8x128xf32>
    %88 = arith.addf %84, %87 : vector<8x128xf32>
    %89 = arith.index_cast %c6_i32 : i32 to index
    %c0_73 = arith.constant 0 : index
    %c0_74 = arith.constant 0 : index
    %90 = vector.load %arg4[%89, %c0_73, %c0_74] : memref<8x8x128xf32, #tpu.memory_space<vmem>>, vector<1x8x128xf32>
    %91 = vector.shape_cast %90 : vector<1x8x128xf32> to vector<8x128xf32>
    %92 = vector.shape_cast %88 : vector<8x128xf32> to vector<1x8x128xf32>
    tpu.vector_store %arg4[%89, %c0_73, %c0_74], %92 {strides = array<i32>} : memref<8x8x128xf32, #tpu.memory_space<vmem>>, vector<1x8x128xf32>,
    %c0_75 = arith.constant 0 : index
    %c0_76 = arith.constant 0 : index
    %93 = vector.load %arg5[%c0_75, %c0_76] : memref<8x128xf32, #tpu.memory_space<vmem>>, vector<8x128xf32>
    tpu.vector_store %arg5[%c0_75, %c0_76], %88 {strides = array<i32>} : memref<8x128xf32, #tpu.memory_space<vmem>>, vector<8x128xf32>,
    %c7_i32 = arith.constant 7 : i32
    %c0_77 = arith.constant 0 : index
    %c0_78 = arith.constant 0 : index
    %94 = vector.load %arg5[%c0_77, %c0_78] : memref<8x128xf32, #tpu.memory_space<vmem>>, vector<8x128xf32>
    %95 = arith.truncf %94 : vector<8x128xf32> to vector<8x128xbf16>
    %c0_79 = arith.constant 0 : index
    %c0_80 = arith.constant 0 : index
    %96 = vector.load %arg3[%c0_79, %c0_80] : memref<128x128xbf16, #tpu.memory_space<vmem>>, vector<128x128xbf16>
    %cst_81 = arith.constant dense<0.000000e+00> : vector<8x128xf32>
    %97 = tpu.matmul %95, %96, %cst_81 {dimension_numbers = #tpu.dot_dimension_numbers<[1], [0], [0], [1], [0, 0, 1, 1], [], []>} : vector<8x128xbf16>, vector<128x128xbf16>, vector<8x128xf32> -> vector<8x128xf32>
    %98 = arith.index_cast %c7_i32 : i32 to index
    %c0_82 = arith.constant 0 : index
    %c0_83 = arith.constant 0 : index
    %99 = vector.load %arg1[%98, %c0_82, %c0_83] : memref<8x8x128xf32, #tpu.memory_space<vmem>>, vector<1x8x128xf32>
    %100 = vector.shape_cast %99 : vector<1x8x128xf32> to vector<8x128xf32>
    %101 = arith.addf %97, %100 : vector<8x128xf32>
    %102 = arith.index_cast %c7_i32 : i32 to index
    %c0_84 = arith.constant 0 : index
    %c0_85 = arith.constant 0 : index
    %103 = vector.load %arg4[%102, %c0_84, %c0_85] : memref<8x8x128xf32, #tpu.memory_space<vmem>>, vector<1x8x128xf32>
    %104 = vector.shape_cast %103 : vector<1x8x128xf32> to vector<8x128xf32>
    %105 = vector.shape_cast %101 : vector<8x128xf32> to vector<1x8x128xf32>
    tpu.vector_store %arg4[%102, %c0_84, %c0_85], %105 {strides = array<i32>} : memref<8x8x128xf32, #tpu.memory_space<vmem>>, vector<1x8x128xf32>,
    %c0_86 = arith.constant 0 : index
    %c0_87 = arith.constant 0 : index
    %106 = vector.load %arg5[%c0_86, %c0_87] : memref<8x128xf32, #tpu.memory_space<vmem>>, vector<8x128xf32>
    tpu.vector_store %arg5[%c0_86, %c0_87], %101 {strides = array<i32>} : memref<8x128xf32, #tpu.memory_space<vmem>>, vector<8x128xf32>,
    %c8_i32 = arith.constant 8 : i32
    return
  }
  func.func @transform_0(%arg0: i32) -> (i32, i32, i32) {
    %c0_i32 = arith.constant 0 : i32
    %c0_i32_0 = arith.constant 0 : i32
    %c0_i32_1 = arith.constant 0 : i32
    return %arg0, %c0_i32, %c0_i32_0 : i32, i32, i32
  }
  func.func @transform_1(%arg0: i32) -> (i32, i32) {
    %c0_i32 = arith.constant 0 : i32
    %c0_i32_0 = arith.constant 0 : i32
    %c0_i32_1 = arith.constant 0 : i32
    return %c0_i32, %c0_i32_0 : i32, i32
  }
  func.func @transform_2(%arg0: i32) -> (i32, i32) {
    %c0_i32 = arith.constant 0 : i32
    %c0_i32_0 = arith.constant 0 : i32
    %c0_i32_1 = arith.constant 0 : i32
    return %c0_i32, %c0_i32_0 : i32, i32
  }
  func.func @transform_3(%arg0: i32) -> (i32, i32, i32) {
    %c0_i32 = arith.constant 0 : i32
    %c0_i32_0 = arith.constant 0 : i32
    %c0_i32_1 = arith.constant 0 : i32
    return %arg0, %c0_i32, %c0_i32_0 : i32, i32, i32
  }
}

</mosaic_0001>

<bundles_post_ra>
// kernel: rnn_sequence.3
= control target key start
LH: loop header
LB: loop body
LE: loop exit
PB: predicated region body
PF: predicated region fallthrough
CT: control target
= control target key end

     0   :  { %s320_s1 = inlined_call_operand.vmem [shape: bf16[128,128], index: 1, kind: input, shape index: {}]   ;;  %s321_s0 = inlined_call_operand.vmem [shape: f32[64,128], index: 0, kind: input, shape index: {}]   ;;  %s322_s2 = inlined_call_operand.vmem [shape: f32[64,128], index: 2, kind: output, shape index: {}]  }
   0x1   :  { %v225_v0 = vld [vmem:[%s320_s1] sm:$0xff]   ;;  %v226_v1 = vld [vmem:[%s320_s1 + $0x8] sm:$0xff]   ;;  %v227_v2 = vld [vmem:[%s320_s1 + $0x10] sm:$0xff]  }
   0x2   :  { %185 = vmatprep.subr.bf16.mxu0 %v225_v0  ;;  %209 = vmatprep.subr.bf16.mxu1 %v225_v0  ;;  %v228_v3 = vld [vmem:[%s320_s1 + $0x18] sm:$0xff]   ;;  %v12_v4 = vld [vmem:[%s321_s0] sm:$0xff]  ;;  %v13_v5 = vld [vmem:[%s321_s0 + $0x8] sm:$0xff] }
   0x3   :  { %186 = vmatpush3.bf16.msra.mxu0 %v225_v0  ;;  %217 = vmatpush3.bf16.msra.mxu1 %v225_v0  ;;  %v16_v6 = vld [vmem:[%s321_s0 + $0x20] sm:$0xff]  ;;  %v20_v7 = vpack.c.bf16 %v13_v5, %v12_v4  ;;  %v17_v8 = vld [vmem:[%s321_s0 + $0x28] sm:$0xff]  ;;  %v231_v12 = vld [vmem:[%s320_s1 + $0x30] sm:$0xff]  }
   0x4   :  { %187 = vmatprep.subr.bf16.mxu0 %v226_v1  ;;  %210 = vmatprep.subr.bf16.mxu1 %v226_v1  ;;  %v22_v9 = vpack.c.bf16 %v17_v8, %v16_v6  ;;  %v229_v10 = vld [vmem:[%s320_s1 + $0x20] sm:$0xff]   ;;  %v230_v11 = vld [vmem:[%s320_s1 + $0x28] sm:$0xff]   ;;  %v232_v13 = vld [vmem:[%s320_s1 + $0x38] sm:$0xff]  }
   0x5   :  { %201 = vmatprep.mubr.bf16.mxu0 %v20_v7  ;;  %v14_v14 = vld [vmem:[%s321_s0 + $0x10] sm:$0xff]  ;;  %v15_v15 = vld [vmem:[%s321_s0 + $0x18] sm:$0xff] }
   0x6   :  { %205 = vmatprep.mubr.bf16.mxu1 %v22_v9  ;;  %v18_v16 = vld [vmem:[%s321_s0 + $0x30] sm:$0xff]  ;;  %v19_v17 = vld [vmem:[%s321_s0 + $0x38] sm:$0xff]  ;;  %v21_v18 = vpack.c.bf16 %v15_v15, %v14_v14 }
   0x7   :  { %188 = vmatpush3.bf16.msra.mxu0 %v226_v1  ;;  %218 = vmatpush3.bf16.msra.mxu1 %v226_v1  ;;  %v23_v19 = vpack.c.bf16 %v19_v17, %v18_v16 }
   0x8   :  { %189 = vmatprep.subr.bf16.mxu0 %v227_v2  ;;  %211 = vmatprep.subr.bf16.mxu1 %v227_v2 }
   0xb   :  { %190 = vmatpush3.bf16.msra.mxu0 %v227_v2  ;;  %219 = vmatpush3.bf16.msra.mxu1 %v227_v2 }
   0xc   :  { %191 = vmatprep.subr.bf16.mxu0 %v228_v3  ;;  %212 = vmatprep.subr.bf16.mxu1 %v228_v3 }
   0xf   :  { %192 = vmatpush3.bf16.msra.mxu0 %v228_v3  ;;  %220 = vmatpush3.bf16.msra.mxu1 %v228_v3 }
  0x10   :  { %193 = vmatprep.subr.bf16.mxu0 %v229_v10  ;;  %213 = vmatprep.subr.bf16.mxu1 %v229_v10 }
  0x13   :  { %194 = vmatpush3.bf16.msra.mxu0 %v229_v10  ;;  %221 = vmatpush3.bf16.msra.mxu1 %v229_v10 }
  0x14   :  { %195 = vmatprep.subr.bf16.mxu0 %v230_v11  ;;  %214 = vmatprep.subr.bf16.mxu1 %v230_v11 }
  0x17   :  { %196 = vmatpush3.bf16.msra.mxu0 %v230_v11  ;;  %222 = vmatpush3.bf16.msra.mxu1 %v230_v11 }
  0x18   :  { %197 = vmatprep.subr.bf16.mxu0 %v231_v12  ;;  %215 = vmatprep.subr.bf16.mxu1 %v231_v12 }
  0x1b   :  { %198 = vmatpush3.bf16.msra.mxu0 %v231_v12  ;;  %223 = vmatpush3.bf16.msra.mxu1 %v231_v12 }
  0x1c   :  { %199 = vmatprep.subr.bf16.mxu0 %v232_v13  ;;  %216 = vmatprep.subr.bf16.mxu1 %v232_v13 }
  0x1f   :  { %200 = vmatpush3.bf16.msra.mxu0 %v232_v13  ;;  %224 = vmatpush3.bf16.msra.mxu1 %v232_v13 }
  0x22   :  { %202 = vmatmul.mubr.bf16.vlgmr.msra.gmra.mrb[0].mxu0 %v21_v18  ;;  %206 = vmatmul.mubr.bf16.vlgmr.msra.gmra.mrb[0].mxu1 %v23_v19 }
  0xf5   :  { %v203_v20 = vpop.f32.mrb[0].mxu0  ;;  %v207_v21 = vpop.f32.mrb[0].mxu1 }
  0xf6   :  { %155 = vst [vmem:[%s322_s2 + $0x10] sm:$0xff] %v203_v20  ;;  %159 = vst [vmem:[%s322_s2 + $0x30] sm:$0xff] %v207_v21  ;;  %v122_v22 = vpop.f32.mrb[1].mxu0  ;;  %v138_v23 = vpop.f32.mrb[1].mxu1 }
  0xf7   :  { %153 = vst [vmem:[%s322_s2] sm:$0xff] %v122_v22  ;;  %157 = vst [vmem:[%s322_s2 + $0x20] sm:$0xff] %v138_v23  ;;  %v204_v24 = vpop.f32.mrb[2].mxu0  ;;  %v208_v25 = vpop.f32.mrb[2].mxu1 }
  0xf8   :  { %156 = vst [vmem:[%s322_s2 + $0x18] sm:$0xff] %v204_v24  ;;  %160 = vst [vmem:[%s322_s2 + $0x38] sm:$0xff] %v208_v25  ;;  %v125_v26 = vpop.f32.mrb[3].mxu0  ;;  %v141_v27 = vpop.f32.mrb[3].mxu1 }
  0xf9   :  { %154 = vst [vmem:[%s322_s2 + $0x8] sm:$0xff] %v125_v26  ;;  %158 = vst [vmem:[%s322_s2 + $0x28] sm:$0xff] %v141_v27 }

// kernel: rnn_sequence.5
= control target key start
LH: loop header
LB: loop body
LE: loop exit
PB: predicated region body
PF: predicated region fallthrough
CT: control target
= control target key end

     0   :  { %s508_s1 = inlined_call_operand.vmem [shape: bf16[128,128], index: 1, kind: input, shape index: {}]   ;;  %s509_s0 = inlined_call_operand.vmem [shape: f32[64,128], index: 0, kind: input, shape index: {}]   ;;  %s510_s2 = inlined_call_operand.vmem [shape: f32[64,128], index: 2, kind: output, shape index: {}]  }
   0x1   :  { %v313_v0 = vld [vmem:[%s508_s1] sm:$0xff]   ;;  %v314_v1 = vld [vmem:[%s508_s1 + $0x8] sm:$0xff]   ;;  %v315_v2 = vld [vmem:[%s508_s1 + $0x10] sm:$0xff]  }
   0x2   :  { %273 = vmatprep.subr.bf16.mxu0 %v313_v0  ;;  %297 = vmatprep.subr.bf16.mxu1 %v313_v0  ;;  %v316_v3 = vld [vmem:[%s508_s1 + $0x18] sm:$0xff]   ;;  %v12_v4 = vld [vmem:[%s509_s0] sm:$0xff]  ;;  %v13_v5 = vld [vmem:[%s509_s0 + $0x8] sm:$0xff] }
   0x3   :  { %274 = vmatpush3.bf16.msra.mxu0 %v313_v0  ;;  %305 = vmatpush3.bf16.msra.mxu1 %v313_v0  ;;  %v20_v6 = vpack.c.bf16 %v13_v5, %v12_v4  ;;  %v16_v7 = vld [vmem:[%s509_s0 + $0x20] sm:$0xff]  ;;  %v17_v8 = vld [vmem:[%s509_s0 + $0x28] sm:$0xff]  ;;  %v319_v12 = vld [vmem:[%s508_s1 + $0x30] sm:$0xff]  }
   0x4   :  { %275 = vmatprep.subr.bf16.mxu0 %v314_v1  ;;  %298 = vmatprep.subr.bf16.mxu1 %v314_v1  ;;  %v22_v9 = vpack.c.bf16 %v17_v8, %v16_v7  ;;  %v317_v10 = vld [vmem:[%s508_s1 + $0x20] sm:$0xff]   ;;  %v318_v11 = vld [vmem:[%s508_s1 + $0x28] sm:$0xff]   ;;  %v320_v13 = vld [vmem:[%s508_s1 + $0x38] sm:$0xff]  }
   0x5   :  { %289 = vmatprep.mubr.bf16.mxu0 %v20_v6  ;;  %v14_v14 = vld [vmem:[%s509_s0 + $0x10] sm:$0xff]  ;;  %v15_v15 = vld [vmem:[%s509_s0 + $0x18] sm:$0xff] }
   0x6   :  { %293 = vmatprep.mubr.bf16.mxu1 %v22_v9  ;;  %v18_v16 = vld [vmem:[%s509_s0 + $0x30] sm:$0xff]  ;;  %v19_v17 = vld [vmem:[%s509_s0 + $0x38] sm:$0xff]  ;;  %v21_v18 = vpack.c.bf16 %v15_v15, %v14_v14 }
   0x7   :  { %276 = vmatpush3.bf16.msra.mxu0 %v314_v1  ;;  %306 = vmatpush3.bf16.msra.mxu1 %v314_v1  ;;  %v23_v19 = vpack.c.bf16 %v19_v17, %v18_v16 }
   0x8   :  { %277 = vmatprep.subr.bf16.mxu0 %v315_v2  ;;  %299 = vmatprep.subr.bf16.mxu1 %v315_v2 }
   0xb   :  { %278 = vmatpush3.bf16.msra.mxu0 %v315_v2  ;;  %307 = vmatpush3.bf16.msra.mxu1 %v315_v2 }
   0xc   :  { %279 = vmatprep.subr.bf16.mxu0 %v316_v3  ;;  %300 = vmatprep.subr.bf16.mxu1 %v316_v3 }
   0xf   :  { %280 = vmatpush3.bf16.msra.mxu0 %v316_v3  ;;  %308 = vmatpush3.bf16.msra.mxu1 %v316_v3 }
  0x10   :  { %281 = vmatprep.subr.bf16.mxu0 %v317_v10  ;;  %301 = vmatprep.subr.bf16.mxu1 %v317_v10 }
  0x13   :  { %282 = vmatpush3.bf16.msra.mxu0 %v317_v10  ;;  %309 = vmatpush3.bf16.msra.mxu1 %v317_v10 }
  0x14   :  { %283 = vmatprep.subr.bf16.mxu0 %v318_v11  ;;  %302 = vmatprep.subr.bf16.mxu1 %v318_v11 }
  0x17   :  { %284 = vmatpush3.bf16.msra.mxu0 %v318_v11  ;;  %310 = vmatpush3.bf16.msra.mxu1 %v318_v11 }
  0x18   :  { %285 = vmatprep.subr.bf16.mxu0 %v319_v12  ;;  %303 = vmatprep.subr.bf16.mxu1 %v319_v12 }
  0x1b   :  { %286 = vmatpush3.bf16.msra.mxu0 %v319_v12  ;;  %311 = vmatpush3.bf16.msra.mxu1 %v319_v12 }
  0x1c   :  { %287 = vmatprep.subr.bf16.mxu0 %v320_v13  ;;  %304 = vmatprep.subr.bf16.mxu1 %v320_v13 }
  0x1f   :  { %288 = vmatpush3.bf16.msra.mxu0 %v320_v13  ;;  %312 = vmatpush3.bf16.msra.mxu1 %v320_v13 }
  0x22   :  { %290 = vmatmul.mubr.bf16.vlgmr.msra.gmra.mrb[0].mxu0 %v21_v18  ;;  %294 = vmatmul.mubr.bf16.vlgmr.msra.gmra.mrb[0].mxu1 %v23_v19 }
  0xf5   :  { %v416_v20 = vpop.f32.mrb[0].mxu0  ;;  %v418_v21 = vpop.f32.mrb[0].mxu1 }
  0xf6   :  { %157 = vmax.xlane.f32.xlu1 %v416_v20  ;;  %v421_v22 = vpop.f32.mrb[1].mxu0  ;;  %v423_v23 = vpop.f32.mrb[1].mxu1 }
  0xf7   :  { %153 = vmax.xlane.f32.xlu0 %v421_v22  ;;  %v426_v24 = vpop.f32.mrb[2].mxu0  ;;  %v428_v25 = vpop.f32.mrb[2].mxu1 }
  0xf8   :  { %v430_v26 = vpop.f32.mrb[3].mxu0  ;;  %v432_v27 = vpop.f32.mrb[3].mxu1 }
  0xfa   :  { %159 = vmax.xlane.f32.xlu1 %v426_v24 }
  0xfb   :  { %161 = vmax.xlane.f32.xlu0 %v423_v23 }
  0xfe   :  { %163 = vmax.xlane.f32.xlu1 %v432_v27 }
  0xff   :  { %155 = vmax.xlane.f32.xlu0 %v430_v26 }
 0x102   :  { %167 = vmax.xlane.f32.xlu1 %v428_v25 }
 0x103   :  { %165 = vmax.xlane.f32.xlu0 %v418_v21 }
 0x183   :  { %v158_v28 = vpop.xlane.xlu1 %157 }
 0x184   :  { %v171_v29 = vsub.f32 %v416_v20, %v158_v28  ;;  %v441_v30 = vpop.xlane.xlu0 %153 }
 0x185   :  { %v169_v31 = vsub.f32 %v421_v22, %v441_v30 }
 0x186   :  { %v181_v32 = vmul.f32 1.442695, %v171_v29 }
 0x187   :  { %v177_v33 = vmul.f32 1.442695, %v169_v31  ;;  %v445_v34 = vpop.xlane.xlu1 %159 }
 0x188   :  { %321 = vpow2.f32 %v181_v32  ;;  %v172_v35 = vsub.f32 %v426_v24, %v445_v34  ;;  %v449_v36 = vpop.xlane.xlu0 %161 }
 0x189   :  { %v173_v37 = vsub.f32 %v423_v23, %v449_v36  ;;  %323 = vpow2.f32 %v177_v33 }
 0x18a   :  { %v183_v38 = vmul.f32 1.442695, %v172_v35 }
 0x18b   :  { %v453_v39 = vpop.xlane.xlu1 %163  ;;  %v185_v40 = vmul.f32 1.442695, %v173_v37 }
 0x18c   :  { %325 = vpow2.f32 %v183_v38  ;;  %v174_v41 = vsub.f32 %v432_v27, %v453_v39  ;;  %v457_v42 = vpop.xlane.xlu0 %155 }
 0x18d   :  { %v170_v43 = vsub.f32 %v430_v26, %v457_v42  ;;  %327 = vpow2.f32 %v185_v40 }
 0x18e   :  { %v187_v46 = vmul.f32 1.442695, %v174_v41 }
 0x18f   :  { %v179_v44 = vmul.f32 1.442695, %v170_v43  ;;  %v461_v45 = vpop.xlane.xlu1 %167 }
 0x190   :  { %v463_v47 = vpop.xlane.xlu0 %165  ;;  %v176_v48 = vsub.f32 %v428_v25, %v461_v45 }
 0x191   :  { %329 = vpow2.f32 %v179_v44  ;;  %v175_v49 = vsub.f32 %v418_v21, %v463_v47 }
 0x192   :  { %v322_v50 = vpop.eup %321  ;;  %331 = vpow2.f32 %v187_v46  ;;  %v191_v53 = vmul.f32 1.442695, %v176_v48 }
 0x193   :  { %v189_v51 = vmul.f32 1.442695, %v175_v49  ;;  %197 = vadd.xlane.f32.xlu0 %v322_v50  ;;  %v324_v52 = vpop.eup %323 }
 0x195   :  { %333 = vpow2.f32 %v189_v51 }
 0x196   :  { %v326_v54 = vpop.eup %325  ;;  %335 = vpow2.f32 %v191_v53 }
 0x197   :  { %199 = vadd.xlane.f32.xlu1 %v326_v54  ;;  %193 = vadd.xlane.f32.xlu0 %v324_v52  ;;  %v328_v55 = vpop.eup %327 }
 0x19b   :  { %v330_v56 = vpop.eup %329  ;;  %201 = vadd.xlane.f32.xlu0 %v328_v55 }
 0x19c   :  { %195 = vadd.xlane.f32.xlu1 %v330_v56  ;;  %v332_v57 = vpop.eup %331 }
 0x19f   :  { %v334_v58 = vpop.eup %333 }
 0x1a0   :  { %203 = vadd.xlane.f32.xlu1 %v332_v57  ;;  %205 = vadd.xlane.f32.xlu0 %v334_v58  ;;  %v336_v59 = vpop.eup %335 }
 0x1a4   :  { %207 = vadd.xlane.f32.xlu1 %v336_v59 }
 0x220   :  { %v198_v60 = vpop.xlane.xlu0 %197 }
 0x221   :  { %337 = vlog2.f32 %v198_v60 }
 0x224   :  { %v200_v61 = vpop.xlane.xlu1 %199  ;;  %v194_v62 = vpop.xlane.xlu0 %193 }
 0x225   :  { %339 = vlog2.f32 %v200_v61 }
 0x226   :  { %341 = vlog2.f32 %v194_v62 }
 0x228   :  { %v202_v63 = vpop.xlane.xlu0 %201 }
 0x229   :  { %343 = vlog2.f32 %v202_v63  ;;  %v196_v0 = vpop.xlane.xlu1 %195 }
 0x22a   :  { %345 = vlog2.f32 %v196_v0 }
 0x22b   :  { %v338_v1 = vpop.eup %337 }
 0x22c   :  { %v214_v2 = vmul.f32 0.6931472, %v338_v1 }
 0x22d   :  { %v204_v3 = vpop.xlane.xlu1 %203  ;;  %v206_v4 = vpop.xlane.xlu0 %205 }
 0x22e   :  { %v227_v5 = vadd.f32 %v214_v2, %v158_v28  ;;  %347 = vlog2.f32 %v204_v3 }
 0x22f   :  { %v340_v6 = vpop.eup %339  ;;  %349 = vlog2.f32 %v206_v4 }
 0x230   :  { %v342_v7 = vpop.eup %341  ;;  %v235_v8 = vsub.f32 %v416_v20, %v227_v5  ;;  %v216_v9 = vmul.f32 0.6931472, %v340_v6 }
 0x231   :  { %v210_v10 = vmul.f32 0.6931472, %v342_v7  ;;  %v208_v11 = vpop.xlane.xlu1 %207 }
 0x232   :  { %243 = vst [vmem:[%s510_s2 + $0x10] sm:$0xff] %v235_v8  ;;  %v228_v12 = vadd.f32 %v216_v9, %v445_v34  ;;  %351 = vlog2.f32 %v208_v11 }
 0x233   :  { %v344_v13 = vpop.eup %343  ;;  %v225_v14 = vadd.f32 %v210_v10, %v441_v30 }
 0x234   :  { %v346_v15 = vpop.eup %345  ;;  %v236_v16 = vsub.f32 %v426_v24, %v228_v12  ;;  %v218_v17 = vmul.f32 0.6931472, %v344_v13 }
 0x235   :  { %v233_v18 = vsub.f32 %v421_v22, %v225_v14  ;;  %v212_v19 = vmul.f32 0.6931472, %v346_v15 }
 0x236   :  { %244 = vst [vmem:[%s510_s2 + $0x18] sm:$0xff] %v236_v16  ;;  %v229_v20 = vadd.f32 %v218_v17, %v449_v36 }
 0x237   :  { %241 = vst [vmem:[%s510_s2] sm:$0xff] %v233_v18  ;;  %v226_v28 = vadd.f32 %v212_v19, %v457_v42 }
 0x238   :  { %v348_v29 = vpop.eup %347  ;;  %v237_v30 = vsub.f32 %v423_v23, %v229_v20 }
 0x239   :  { %v350_v24 = vpop.eup %349  ;;  %v234_v31 = vsub.f32 %v430_v26, %v226_v28  ;;  %v220_v22 = vmul.f32 0.6931472, %v348_v29 }
 0x23a   :  { %245 = vst [vmem:[%s510_s2 + $0x20] sm:$0xff] %v237_v30  ;;  %v222_v32 = vmul.f32 0.6931472, %v350_v24 }
 0x23b   :  { %242 = vst [vmem:[%s510_s2 + $0x8] sm:$0xff] %v234_v31  ;;  %v230_v33 = vadd.f32 %v220_v22, %v453_v39 }
 0x23c   :  { %v352_v34 = vpop.eup %351  ;;  %v231_v35 = vadd.f32 %v222_v32, %v463_v47 }
 0x23d   :  { %v238_v23 = vsub.f32 %v432_v27, %v230_v33  ;;  %v224_v36 = vmul.f32 0.6931472, %v352_v34 }
 0x23e   :  { %v239_v26 = vsub.f32 %v418_v21, %v231_v35 }
 0x23f   :  { %246 = vst [vmem:[%s510_s2 + $0x28] sm:$0xff] %v238_v23  ;;  %v232_v37 = vadd.f32 %v224_v36, %v461_v45 }
 0x240   :  { %247 = vst [vmem:[%s510_s2 + $0x30] sm:$0xff] %v239_v26 }
 0x241   :  { %v240_v38 = vsub.f32 %v428_v25, %v232_v37 }
 0x243   :  { %248 = vst [vmem:[%s510_s2 + $0x38] sm:$0xff] %v240_v38 }

// kernel: rnn_sequence.4
= control target key start
LH: loop header
LB: loop body
LE: loop exit
PB: predicated region body
PF: predicated region fallthrough
CT: control target
= control target key end

     0   :  { %v1287_v0 = vmov 0.0   ;;  %vm1288_vm0 = vmmov 0   ;;  %s1632_s2 = inlined_call_operand.vmem [shape: bf16[128,128], index: 2, kind: input, shape index: {}]   ;;  %s1633_s1 = inlined_call_operand.vmem [shape: f32[8,128], index: 1, kind: input, shape index: {}]   ;;  %s1634_s0 = inlined_call_operand.vmem [shape: f32[8,8,128], index: 0, kind: input, shape index: {}]   ;;  %s1635_s3 = inlined_call_operand.vmem [shape: f32[8,8,128], index: 3, kind: output, shape index: {}]  }
   0x1   :  { %1061 = vmatprep.subr.bf16.mxu0 %v1287_v0  ;;  %v1223_v1 = vld [vmem:[%s1632_s2] sm:$0xff]   ;;  %1077 = vmatprep.mubr.msk.bf16.mxu0 %vm1288_vm0, %v1287_v0  ;;  %v1224_v2 = vld [vmem:[%s1632_s2 + $0x8] sm:$0xff]   ;;  %v1225_v3 = vld [vmem:[%s1632_s2 + $0x10] sm:$0xff]  }
   0x2   :  { %1081 = vmatprep.subr.bf16.mxu1 %v1287_v0  ;;  %1097 = vmatprep.mubr.msk.bf16.mxu1 %vm1288_vm0, %v1287_v0  ;;  %v1231_v4 = vld [vmem:[%s1632_s2] sm:$0xff]   ;;  %v1226_v5 = vld [vmem:[%s1632_s2 + $0x18] sm:$0xff]   ;;  %v1232_v6 = vld [vmem:[%s1632_s2 + $0x8] sm:$0xff]  }
   0x3   :  { %1062 = vmatpush3.bf16.msra.mxu0 %v1223_v1  ;;  %1082 = vmatpush3.bf16.msra.mxu1 %v1231_v4  ;;  %v1227_v7 = vld [vmem:[%s1632_s2 + $0x20] sm:$0xff]   ;;  %v1233_v8 = vld [vmem:[%s1632_s2 + $0x10] sm:$0xff]   ;;  %v1228_v9 = vld [vmem:[%s1632_s2 + $0x28] sm:$0xff]  }
   0x4   :  { %1063 = vmatprep.subr.bf16.mxu0 %v1287_v0  ;;  %1083 = vmatprep.subr.bf16.mxu1 %v1287_v0  ;;  %v1234_v10 = vld [vmem:[%s1632_s2 + $0x18] sm:$0xff]   ;;  %v1229_v11 = vld [vmem:[%s1632_s2 + $0x30] sm:$0xff]   ;;  %v1235_v12 = vld [vmem:[%s1632_s2 + $0x20] sm:$0xff]  }
   0x5   :  { %v1230_v13 = vld [vmem:[%s1632_s2 + $0x38] sm:$0xff]   ;;  %v19_v14 = vld [vmem:[%s1633_s1] sm:$0xff]  ;;  %v1236_v15 = vld [vmem:[%s1632_s2 + $0x28] sm:$0xff]  }
   0x6   :  { %v22_v16 = vpack.c.bf16 %v19_v14, %v19_v14  ;;  %v1237_v17 = vld [vmem:[%s1632_s2 + $0x30] sm:$0xff]   ;;  %v1238_v18 = vld [vmem:[%s1632_s2 + $0x38] sm:$0xff]   ;;  %v1239_v19 = vld [vmem:[%s1632_s2] sm:$0xff]  }
   0x7   :  { %1064 = vmatpush3.bf16.msra.mxu0 %v1224_v2  ;;  %1084 = vmatpush3.bf16.msra.mxu1 %v1232_v6  ;;  %v1240_v20 = vld [vmem:[%s1632_s2 + $0x8] sm:$0xff]   ;;  %v1241_v21 = vld [vmem:[%s1632_s2 + $0x10] sm:$0xff]   ;;  %v1242_v22 = vld [vmem:[%s1632_s2 + $0x18] sm:$0xff]  }
   0x8   :  { %1065 = vmatprep.subr.bf16.mxu0 %v1287_v0  ;;  %1085 = vmatprep.subr.bf16.mxu1 %v1287_v0  ;;  %v1243_v23 = vld [vmem:[%s1632_s2 + $0x20] sm:$0xff]   ;;  %v1244_v24 = vld [vmem:[%s1632_s2 + $0x28] sm:$0xff]   ;;  %v1245_v25 = vld [vmem:[%s1632_s2 + $0x30] sm:$0xff]  }
   0x9   :  { %v39_v26 = vld [vmem:[%s1634_s0] sm:$0xff]  ;;  %v1246_v33 = vld [vmem:[%s1632_s2 + $0x38] sm:$0xff]   ;;  %v1248_v35 = vld [vmem:[%s1632_s2 + $0x8] sm:$0xff]  }
   0xa   :  { %v1247_v34 = vld [vmem:[%s1632_s2] sm:$0xff]   ;;  %v1249_v36 = vld [vmem:[%s1632_s2 + $0x10] sm:$0xff]   ;;  %v1250_v37 = vld [vmem:[%s1632_s2 + $0x18] sm:$0xff]  }
   0xb   :  { %1066 = vmatpush3.bf16.msra.mxu0 %v1225_v3  ;;  %1086 = vmatpush3.bf16.msra.mxu1 %v1233_v8  ;;  %v1251_v38 = vld [vmem:[%s1632_s2 + $0x20] sm:$0xff]   ;;  %v1252_v39 = vld [vmem:[%s1632_s2 + $0x28] sm:$0xff]   ;;  %v1253_v40 = vld [vmem:[%s1632_s2 + $0x30] sm:$0xff]  }
   0xc   :  { %1067 = vmatprep.subr.bf16.mxu0 %v1287_v0  ;;  %1087 = vmatprep.subr.bf16.mxu1 %v1287_v0  ;;  %v919_v41 = vld [vmem:[%s1634_s0 + $0x8] sm:$0xff]  ;;  %v1254_v48 = vld [vmem:[%s1632_s2 + $0x38] sm:$0xff]   ;;  %v1255_v49 = vld [vmem:[%s1632_s2] sm:$0xff]  }
   0xd   :  { %v1256_v50 = vld [vmem:[%s1632_s2 + $0x8] sm:$0xff]   ;;  %v1257_v51 = vld [vmem:[%s1632_s2 + $0x10] sm:$0xff]   ;;  %v1258_v52 = vld [vmem:[%s1632_s2 + $0x18] sm:$0xff]  }
   0xe   :  { %v1259_v53 = vld [vmem:[%s1632_s2 + $0x20] sm:$0xff]   ;;  %v1260_v54 = vld [vmem:[%s1632_s2 + $0x28] sm:$0xff]   ;;  %v1261_v55 = vld [vmem:[%s1632_s2 + $0x30] sm:$0xff]  }
   0xf   :  { %1068 = vmatpush3.bf16.msra.mxu0 %v1226_v5  ;;  %1088 = vmatpush3.bf16.msra.mxu1 %v1234_v10  ;;  %v929_v56 = vld [vmem:[%s1634_s0 + $0x10] sm:$0xff]  ;;  %v1262_v63 = vld [vmem:[%s1632_s2 + $0x38] sm:$0xff]   ;;  %v1263_v1 = vld [vmem:[%s1632_s2] sm:$0xff]  }
  0x10   :  { %1069 = vmatprep.subr.bf16.mxu0 %v1287_v0  ;;  %1089 = vmatprep.subr.bf16.mxu1 %v1287_v0  ;;  %v1264_v2 = vld [vmem:[%s1632_s2 + $0x8] sm:$0xff]   ;;  %v1265_v3 = vld [vmem:[%s1632_s2 + $0x10] sm:$0xff]   ;;  %v1266_v4 = vld [vmem:[%s1632_s2 + $0x18] sm:$0xff]  }
  0x11   :  { %v1267_v5 = vld [vmem:[%s1632_s2 + $0x20] sm:$0xff]   ;;  %v1268_v6 = vld [vmem:[%s1632_s2 + $0x28] sm:$0xff]   ;;  %v939_v8 = vld [vmem:[%s1634_s0 + $0x18] sm:$0xff] }
  0x13   :  { %1070 = vmatpush3.bf16.msra.mxu0 %v1227_v7  ;;  %1090 = vmatpush3.bf16.msra.mxu1 %v1235_v12  ;;  %v1269_v7 = vld [vmem:[%s1632_s2 + $0x30] sm:$0xff]  }
  0x14   :  { %1071 = vmatprep.subr.bf16.mxu0 %v1287_v0  ;;  %1091 = vmatprep.subr.bf16.mxu1 %v1287_v0 }
  0x17   :  { %1072 = vmatpush3.bf16.msra.mxu0 %v1228_v9  ;;  %1092 = vmatpush3.bf16.msra.mxu1 %v1236_v15  ;;  %v1270_v15 = vld [vmem:[%s1632_s2 + $0x38] sm:$0xff]  }
  0x18   :  { %1073 = vmatprep.subr.bf16.mxu0 %v1287_v0  ;;  %1093 = vmatprep.subr.bf16.mxu1 %v1287_v0 }
  0x1b   :  { %1074 = vmatpush3.bf16.msra.mxu0 %v1229_v11  ;;  %1094 = vmatpush3.bf16.msra.mxu1 %v1237_v17  ;;  %v1272_v17 = vld [vmem:[%s1632_s2 + $0x8] sm:$0xff]  }
  0x1c   :  { %1075 = vmatprep.subr.bf16.mxu0 %v1287_v0  ;;  %1095 = vmatprep.subr.bf16.mxu1 %v1287_v0 }
  0x1f   :  { %1076 = vmatpush3.bf16.msra.mxu0 %v1230_v13  ;;  %1096 = vmatpush3.bf16.msra.mxu1 %v1238_v18  ;;  %v1273_v18 = vld [vmem:[%s1632_s2 + $0x10] sm:$0xff]  }
  0x20   :  { %1101 = vmatprep.subr.bf16.mxu0 %v1287_v0  ;;  %1121 = vmatprep.subr.bf16.mxu1 %v1287_v0 }
  0x22   :  { %1078 = vmatmul.mubr.bf16.vlgmr.msra.gmra.mrb[0].mxu0 %v22_v16  ;;  %v1271_v16 = vld [vmem:[%s1632_s2] sm:$0xff]  }
  0x23   :  { %1117 = vmatprep.mubr.msk.bf16.mxu0 %vm1288_vm0, %v1287_v0  ;;  %1102 = vmatpush3.bf16.msra.mxu0 %v1239_v19  ;;  %v1274_v19 = vld [vmem:[%s1632_s2 + $0x18] sm:$0xff]  }
  0x24   :  { %1103 = vmatprep.subr.bf16.mxu0 %v1287_v0 }
  0x27   :  { %1104 = vmatpush3.bf16.msra.mxu0 %v1240_v20  ;;  %v1275_v20 = vld [vmem:[%s1632_s2 + $0x20] sm:$0xff]  }
  0x28   :  { %1105 = vmatprep.subr.bf16.mxu0 %v1287_v0 }
  0x2b   :  { %1106 = vmatpush3.bf16.msra.mxu0 %v1241_v21  ;;  %v1276_v21 = vld [vmem:[%s1632_s2 + $0x28] sm:$0xff]  }
  0x2c   :  { %1107 = vmatprep.subr.bf16.mxu0 %v1287_v0 }
  0x2f   :  { %1108 = vmatpush3.bf16.msra.mxu0 %v1242_v22  ;;  %v1277_v22 = vld [vmem:[%s1632_s2 + $0x30] sm:$0xff]  }
  0x30   :  { %1109 = vmatprep.subr.bf16.mxu0 %v1287_v0 }
  0x33   :  { %1110 = vmatpush3.bf16.msra.mxu0 %v1243_v23  ;;  %v949_v23 = vld [vmem:[%s1634_s0 + $0x20] sm:$0xff] }
  0x34   :  { %1111 = vmatprep.subr.bf16.mxu0 %v1287_v0 }
  0x37   :  { %1112 = vmatpush3.bf16.msra.mxu0 %v1244_v24 }
  0x38   :  { %1113 = vmatprep.subr.bf16.mxu0 %v1287_v0 }
  0x3b   :  { %1114 = vmatpush3.bf16.msra.mxu0 %v1245_v25 }
  0x3c   :  { %1115 = vmatprep.subr.bf16.mxu0 %v1287_v0 }
  0x3f   :  { %1116 = vmatpush3.bf16.msra.mxu0 %v1246_v33  ;;  %v1281_v33 = vld [vmem:[%s1632_s2 + $0x10] sm:$0xff]  }
  0x40   :  { %1141 = vmatprep.subr.bf16.mxu0 %v1287_v0 }
  0xf5   :  { %v122_v27 = vpop.f32.mrb[0].mxu0 }
  0xf6   :  { %v123_v28 = vadd.f32 %v122_v27, %v39_v26  ;;  %v1079_v29 = vpop.f32.mrb[1].mxu0 }
  0xf7   :  { %v125_v30 = vpop.f32.mrb[2].mxu0 }
  0xf8   :  { %128 = vst [vmem:[%s1635_s3] sm:$0xff] %v123_v28  ;;  %v131_v31 = vpack.c.bf16 %v123_v28, %v123_v28  ;;  %v1080_v32 = vpop.f32.mrb[3].mxu0  ;;  %v1278_v30 = vld [vmem:[%s1632_s2 + $0x38] sm:$0xff]  }
  0xf9   :  { %v1280_v32 = vld [vmem:[%s1632_s2 + $0x8] sm:$0xff]  }
  0xfa   :  { %1098 = vmatmul.mubr.bf16.vlgmr.msra.gmra.mrb[0].mxu1 %v131_v31  ;;  %v1279_v31 = vld [vmem:[%s1632_s2] sm:$0xff]  }
  0xfb   :  { %1137 = vmatprep.mubr.msk.bf16.mxu1 %vm1288_vm0, %v1287_v0  ;;  %1122 = vmatpush3.bf16.msra.mxu1 %v1247_v34  ;;  %v1282_v34 = vld [vmem:[%s1632_s2 + $0x18] sm:$0xff]  }
  0xfc   :  { %1123 = vmatprep.subr.bf16.mxu1 %v1287_v0 }
  0xff   :  { %1124 = vmatpush3.bf16.msra.mxu1 %v1248_v35  ;;  %v1283_v35 = vld [vmem:[%s1632_s2 + $0x20] sm:$0xff]  }
 0x100   :  { %1125 = vmatprep.subr.bf16.mxu1 %v1287_v0 }
 0x103   :  { %1126 = vmatpush3.bf16.msra.mxu1 %v1249_v36  ;;  %v1284_v36 = vld [vmem:[%s1632_s2 + $0x28] sm:$0xff]  }
 0x104   :  { %1127 = vmatprep.subr.bf16.mxu1 %v1287_v0 }
 0x107   :  { %1128 = vmatpush3.bf16.msra.mxu1 %v1250_v37  ;;  %v1285_v37 = vld [vmem:[%s1632_s2 + $0x30] sm:$0xff]  }
 0x108   :  { %1129 = vmatprep.subr.bf16.mxu1 %v1287_v0 }
 0x10b   :  { %1130 = vmatpush3.bf16.msra.mxu1 %v1251_v38  ;;  %v959_v38 = vld [vmem:[%s1634_s0 + $0x28] sm:$0xff] }
 0x10c   :  { %1131 = vmatprep.subr.bf16.mxu1 %v1287_v0 }
 0x10f   :  { %1132 = vmatpush3.bf16.msra.mxu1 %v1252_v39 }
 0x110   :  { %1133 = vmatprep.subr.bf16.mxu1 %v1287_v0 }
 0x113   :  { %1134 = vmatpush3.bf16.msra.mxu1 %v1253_v40 }
 0x114   :  { %1135 = vmatprep.subr.bf16.mxu1 %v1287_v0 }
 0x117   :  { %1136 = vmatpush3.bf16.msra.mxu1 %v1254_v48 }
 0x118   :  { %1161 = vmatprep.subr.bf16.mxu1 %v1287_v0 }
 0x1cd   :  { %v232_v42 = vpop.f32.mrb[0].mxu1 }
 0x1ce   :  { %v233_v43 = vadd.f32 %v919_v41, %v232_v42  ;;  %v1099_v44 = vpop.f32.mrb[1].mxu1 }
 0x1cf   :  { %v235_v45 = vpop.f32.mrb[2].mxu1 }
 0x1d0   :  { %928 = vst [vmem:[%s1635_s3 + $0x8] sm:$0xff] %v233_v43  ;;  %v242_v46 = vpack.c.bf16 %v233_v43, %v233_v43  ;;  %v1100_v47 = vpop.f32.mrb[3].mxu1  ;;  %v1286_v45 = vld [vmem:[%s1632_s2 + $0x38] sm:$0xff]  }
 0x1d2   :  { %1118 = vmatmul.mubr.bf16.vlgmr.msra.gmra.mrb[4].mxu0 %v242_v46 }
 0x1d3   :  { %1157 = vmatprep.mubr.msk.bf16.mxu0 %vm1288_vm0, %v1287_v0  ;;  %1142 = vmatpush3.bf16.msra.mxu0 %v1255_v49 }
 0x1d4   :  { %1143 = vmatprep.subr.bf16.mxu0 %v1287_v0 }
 0x1d7   :  { %1144 = vmatpush3.bf16.msra.mxu0 %v1256_v50 }
 0x1d8   :  { %1145 = vmatprep.subr.bf16.mxu0 %v1287_v0 }
 0x1db   :  { %1146 = vmatpush3.bf16.msra.mxu0 %v1257_v51 }
 0x1dc   :  { %1147 = vmatprep.subr.bf16.mxu0 %v1287_v0 }
 0x1df   :  { %1148 = vmatpush3.bf16.msra.mxu0 %v1258_v52  ;;  %v979_v52 = vld [vmem:[%s1634_s0 + $0x38] sm:$0xff] }
 0x1e0   :  { %1149 = vmatprep.subr.bf16.mxu0 %v1287_v0 }
 0x1e3   :  { %1150 = vmatpush3.bf16.msra.mxu0 %v1259_v53 }
 0x1e4   :  { %1151 = vmatprep.subr.bf16.mxu0 %v1287_v0 }
 0x1e7   :  { %1152 = vmatpush3.bf16.msra.mxu0 %v1260_v54 }
 0x1e8   :  { %1153 = vmatprep.subr.bf16.mxu0 %v1287_v0 }
 0x1eb   :  { %1154 = vmatpush3.bf16.msra.mxu0 %v1261_v55 }
 0x1ec   :  { %1155 = vmatprep.subr.bf16.mxu0 %v1287_v0 }
 0x1ef   :  { %1156 = vmatpush3.bf16.msra.mxu0 %v1262_v63 }
 0x1f0   :  { %1181 = vmatprep.subr.bf16.mxu0 %v1287_v0 }
 0x2a5   :  { %v343_v57 = vpop.f32.mrb[4].mxu0 }
 0x2a6   :  { %v344_v58 = vadd.f32 %v929_v56, %v343_v57  ;;  %v1119_v59 = vpop.f32.mrb[5].mxu0 }
 0x2a7   :  { %v346_v60 = vpop.f32.mrb[6].mxu0 }
 0x2a8   :  { %938 = vst [vmem:[%s1635_s3 + $0x10] sm:$0xff] %v344_v58  ;;  %v353_v61 = vpack.c.bf16 %v344_v58, %v344_v58  ;;  %v1120_v62 = vpop.f32.mrb[7].mxu0 }
 0x2aa   :  { %1138 = vmatmul.mubr.bf16.vlgmr.msra.gmra.mrb[4].mxu1 %v353_v61 }
 0x2ab   :  { %1177 = vmatprep.mubr.msk.bf16.mxu1 %vm1288_vm0, %v1287_v0  ;;  %1162 = vmatpush3.bf16.msra.mxu1 %v1263_v1 }
 0x2ac   :  { %1163 = vmatprep.subr.bf16.mxu1 %v1287_v0 }
 0x2af   :  { %1164 = vmatpush3.bf16.msra.mxu1 %v1264_v2 }
 0x2b0   :  { %1165 = vmatprep.subr.bf16.mxu1 %v1287_v0 }
 0x2b3   :  { %1166 = vmatpush3.bf16.msra.mxu1 %v1265_v3 }
 0x2b4   :  { %1167 = vmatprep.subr.bf16.mxu1 %v1287_v0 }
 0x2b7   :  { %1168 = vmatpush3.bf16.msra.mxu1 %v1266_v4 }
 0x2b8   :  { %1169 = vmatprep.subr.bf16.mxu1 %v1287_v0 }
 0x2bb   :  { %1170 = vmatpush3.bf16.msra.mxu1 %v1267_v5 }
 0x2bc   :  { %1171 = vmatprep.subr.bf16.mxu1 %v1287_v0 }
 0x2bf   :  { %1172 = vmatpush3.bf16.msra.mxu1 %v1268_v6 }
 0x2c0   :  { %1173 = vmatprep.subr.bf16.mxu1 %v1287_v0 }
 0x2c3   :  { %1174 = vmatpush3.bf16.msra.mxu1 %v1269_v7 }
 0x2c4   :  { %1175 = vmatprep.subr.bf16.mxu1 %v1287_v0 }
 0x2c7   :  { %1176 = vmatpush3.bf16.msra.mxu1 %v1270_v15 }
 0x2c8   :  { %1201 = vmatprep.subr.bf16.mxu1 %v1287_v0 }
 0x37d   :  { %v454_v9 = vpop.f32.mrb[4].mxu1 }
 0x37e   :  { %v455_v10 = vadd.f32 %v939_v8, %v454_v9  ;;  %v1139_v11 = vpop.f32.mrb[5].mxu1 }
 0x37f   :  { %v457_v12 = vpop.f32.mrb[6].mxu1 }
 0x380   :  { %948 = vst [vmem:[%s1635_s3 + $0x18] sm:$0xff] %v455_v10  ;;  %v464_v13 = vpack.c.bf16 %v455_v10, %v455_v10  ;;  %v1140_v14 = vpop.f32.mrb[7].mxu1 }
 0x382   :  { %1158 = vmatmul.mubr.bf16.vlgmr.msra.gmra.mrb[8].mxu0 %v464_v13 }
 0x383   :  { %1197 = vmatprep.mubr.msk.bf16.mxu0 %vm1288_vm0, %v1287_v0  ;;  %1182 = vmatpush3.bf16.msra.mxu0 %v1271_v16 }
 0x384   :  { %1183 = vmatprep.subr.bf16.mxu0 %v1287_v0 }
 0x387   :  { %1184 = vmatpush3.bf16.msra.mxu0 %v1272_v17 }
 0x388   :  { %1185 = vmatprep.subr.bf16.mxu0 %v1287_v0 }
 0x38b   :  { %1186 = vmatpush3.bf16.msra.mxu0 %v1273_v18 }
 0x38c   :  { %1187 = vmatprep.subr.bf16.mxu0 %v1287_v0 }
 0x38f   :  { %1188 = vmatpush3.bf16.msra.mxu0 %v1274_v19 }
 0x390   :  { %1189 = vmatprep.subr.bf16.mxu0 %v1287_v0 }
 0x393   :  { %1190 = vmatpush3.bf16.msra.mxu0 %v1275_v20 }
 0x394   :  { %1191 = vmatprep.subr.bf16.mxu0 %v1287_v0 }
 0x397   :  { %1192 = vmatpush3.bf16.msra.mxu0 %v1276_v21 }
 0x398   :  { %1193 = vmatprep.subr.bf16.mxu0 %v1287_v0 }
 0x39b   :  { %1194 = vmatpush3.bf16.msra.mxu0 %v1277_v22 }
 0x39c   :  { %1195 = vmatprep.subr.bf16.mxu0 %v1287_v0 }
 0x39f   :  { %1196 = vmatpush3.bf16.msra.mxu0 %v1278_v30 }
 0x455   :  { %v565_v24 = vpop.f32.mrb[8].mxu0 }
 0x456   :  { %v566_v25 = vadd.f32 %v949_v23, %v565_v24  ;;  %v1159_v26 = vpop.f32.mrb[9].mxu0 }
 0x457   :  { %v568_v27 = vpop.f32.mrb[10].mxu0 }
 0x458   :  { %958 = vst [vmem:[%s1635_s3 + $0x20] sm:$0xff] %v566_v25  ;;  %v575_v28 = vpack.c.bf16 %v566_v25, %v566_v25  ;;  %v1160_v29 = vpop.f32.mrb[11].mxu0 }
 0x45a   :  { %1178 = vmatmul.mubr.bf16.vlgmr.msra.gmra.mrb[8].mxu1 %v575_v28 }
 0x45b   :  { %1217 = vmatprep.mubr.msk.bf16.mxu1 %vm1288_vm0, %v1287_v0  ;;  %1202 = vmatpush3.bf16.msra.mxu1 %v1279_v31 }
 0x45c   :  { %1203 = vmatprep.subr.bf16.mxu1 %v1287_v0 }
 0x45f   :  { %1204 = vmatpush3.bf16.msra.mxu1 %v1280_v32 }
 0x460   :  { %1205 = vmatprep.subr.bf16.mxu1 %v1287_v0 }
 0x463   :  { %1206 = vmatpush3.bf16.msra.mxu1 %v1281_v33 }
 0x464   :  { %1207 = vmatprep.subr.bf16.mxu1 %v1287_v0 }
 0x467   :  { %1208 = vmatpush3.bf16.msra.mxu1 %v1282_v34 }
 0x468   :  { %1209 = vmatprep.subr.bf16.mxu1 %v1287_v0 }
 0x46b   :  { %1210 = vmatpush3.bf16.msra.mxu1 %v1283_v35 }
 0x46c   :  { %1211 = vmatprep.subr.bf16.mxu1 %v1287_v0 }
 0x46f   :  { %1212 = vmatpush3.bf16.msra.mxu1 %v1284_v36 }
 0x470   :  { %1213 = vmatprep.subr.bf16.mxu1 %v1287_v0 }
 0x473   :  { %1214 = vmatpush3.bf16.msra.mxu1 %v1285_v37 }
 0x474   :  { %1215 = vmatprep.subr.bf16.mxu1 %v1287_v0  ;;  %v969_v0 = vld [vmem:[%s1634_s0 + $0x30] sm:$0xff] }
 0x477   :  { %1216 = vmatpush3.bf16.msra.mxu1 %v1286_v45 }
 0x52d   :  { %v676_v39 = vpop.f32.mrb[8].mxu1 }
 0x52e   :  { %v677_v40 = vadd.f32 %v959_v38, %v676_v39  ;;  %v1179_v41 = vpop.f32.mrb[9].mxu1 }
 0x52f   :  { %v679_v42 = vpop.f32.mrb[10].mxu1 }
 0x530   :  { %968 = vst [vmem:[%s1635_s3 + $0x28] sm:$0xff] %v677_v40  ;;  %v686_v43 = vpack.c.bf16 %v677_v40, %v677_v40  ;;  %v1180_v44 = vpop.f32.mrb[11].mxu1 }
 0x532   :  { %1198 = vmatmul.mubr.bf16.vlgmr.msra.gmra.mrb[12].mxu0 %v686_v43 }
 0x605   :  { %v787_v46 = vpop.f32.mrb[12].mxu0 }
 0x606   :  { %v788_v47 = vadd.f32 %v969_v0, %v787_v46  ;;  %v1199_v48 = vpop.f32.mrb[13].mxu0 }
 0x607   :  { %v790_v49 = vpop.f32.mrb[14].mxu0 }
 0x608   :  { %978 = vst [vmem:[%s1635_s3 + $0x30] sm:$0xff] %v788_v47  ;;  %v797_v50 = vpack.c.bf16 %v788_v47, %v788_v47  ;;  %v1200_v51 = vpop.f32.mrb[15].mxu0 }
 0x60a   :  { %1218 = vmatmul.mubr.bf16.vlgmr.msra.gmra.mrb[12].mxu1 %v797_v50 }
 0x6dd   :  { %v898_v53 = vpop.f32.mrb[12].mxu1 }
 0x6de   :  { %v899_v54 = vadd.f32 %v979_v52, %v898_v53  ;;  %v1219_v55 = vpop.f32.mrb[13].mxu1 }
 0x6df   :  { %v901_v56 = vpop.f32.mrb[14].mxu1 }
 0x6e0   :  { %988 = vst [vmem:[%s1635_s3 + $0x38] sm:$0xff] %v899_v54  ;;  %v1220_v57 = vpop.f32.mrb[15].mxu1 }

</bundles_post_ra>
